<compile_context>
chip_gen: v7x
topology: tpu7x:2x2x1
jax: 0.10.0
libtpu: 0.0.40
codegen_flags: <defaults>
</compile_context>

<pallas_src>
import jax
import jax.numpy as jnp
from jax.experimental import pallas as pl
from jax.experimental.pallas import tpu as pltpu


def _slice_copy_dma_kernel(table_ref, out_ref, sem):
    # Single HBM->HBM DMA of the first `seq` rows of the embedding table.
    seq = out_ref.shape[0]
    cp = pltpu.make_async_copy(table_ref.at[pl.ds(0, seq)], out_ref, sem)
    cp.start()
    cp.wait()


def positional_embedding(x, embedding_table):
    """x: (batch, seq, ...) — only x.shape[1] is consulted (as in the torch module).
    embedding_table: (max_len, d_model).
    Returns (1, seq, d_model) == embedding_table[arange(seq)][None]."""
    seq = x.shape[1]
    max_len, d_model = embedding_table.shape
    assert seq <= max_len, (seq, max_len)

    out = pl.pallas_call(
        _slice_copy_dma_kernel,
        out_shape=jax.ShapeDtypeStruct((seq, d_model), embedding_table.dtype),
        in_specs=[pl.BlockSpec(memory_space=pl.ANY)],
        out_specs=pl.BlockSpec(memory_space=pl.ANY),
        scratch_shapes=[pltpu.SemaphoreType.DMA(())],
    )(embedding_table)

    # (seq, d_model) -> (1, seq, d_model), matching torch's unsqueeze(0).
    return out.reshape(1, seq, d_model)


if __name__ == "__main__":
    key = jax.random.PRNGKey(0)
    k_emb, k_x = jax.random.split(key)

    max_len, d_model = 16, 32
    batch, seq = 2, 8

    # nn.Embedding default init: weight ~ N(0, 1)
    embedding_table = jax.random.normal(k_emb, (max_len, d_model), dtype=jnp.float32)

    # x is only consulted for its seq length (x.size(1))
    x = jax.random.normal(k_x, (batch, seq, d_model), dtype=jnp.float32)

    out = positional_embedding(x, embedding_table)
    out = jax.block_until_ready(out)

    # reference: embedding_table[arange(seq)][None]
    ref = embedding_table[jnp.arange(seq)][None]
    assert out.shape == (1, seq, d_model), out.shape
    assert jnp.allclose(out, ref), "mismatch vs reference slice"

    # Edge case from review: seq not a multiple of 8 and within 7 of max_len.
    # The DMA copies exactly seq rows, so there is no over-read past the table.
    seq2 = max_len - 3  # 13
    x2 = jax.random.normal(k_x, (batch, seq2, d_model), dtype=jnp.float32)
    out2 = jax.block_until_ready(positional_embedding(x2, embedding_table))
    ref2 = embedding_table[jnp.arange(seq2)][None]
    assert out2.shape == (1, seq2, d_model), out2.shape
    assert jnp.allclose(out2, ref2), "mismatch vs reference slice (ragged seq)"

    print("KERNEL_OK")
</pallas_src>

<mosaic_0001>
module attributes {stable_mosaic.version = 11 : i64} {
  func.func @_slice_copy_dma_kernel(%arg0: memref<16x32xf32, #tpu.memory_space<any>>, %arg1: memref<8x32xf32, #tpu.memory_space<any>>, %arg2: memref<!tpu.dma_semaphore, #tpu.memory_space<semaphore_mem>>) attributes {dimension_semantics = [], scalar_prefetch = 0 : i64, scratch_operands = 1 : i64, tpu.core_type = #tpu.core_type<tc>} {
    %c0_i32 = arith.constant 0 : i32
    %c0_i32_0 = arith.constant 0 : i32
    %0 = tpu.memref_slice %arg0[%c0_i32, %c0_i32_0] : memref<16x32xf32, #tpu.memory_space<any>> -> memref<8x32xf32, #tpu.memory_space<any>>
    tpu.enqueue_dma source(%0 : memref<8x32xf32, #tpu.memory_space<any>>) target(%arg1 : memref<8x32xf32, #tpu.memory_space<any>>) target_semaphore(%arg2 : memref<!tpu.dma_semaphore, #tpu.memory_space<semaphore_mem>>)
    %c0_i32_1 = arith.constant 0 : i32
    %c0_i32_2 = arith.constant 0 : i32
    %1 = tpu.memref_slice %arg0[%c0_i32_1, %c0_i32_2] : memref<16x32xf32, #tpu.memory_space<any>> -> memref<8x32xf32, #tpu.memory_space<any>>
    tpu.wait_dma2 semaphore(%arg2 : memref<!tpu.dma_semaphore, #tpu.memory_space<semaphore_mem>>) src(%1 : memref<8x32xf32, #tpu.memory_space<any>>) dst(%arg1 : memref<8x32xf32, #tpu.memory_space<any>>)
    return
  }
}

</mosaic_0001>

<bundles_post_ra>
// kernel: tpu_custom_call.1
= control target key start
LH: loop header
LB: loop body
LE: loop exit
PB: predicated region body
PF: predicated region fallthrough
CT: control target
= control target key end

     0   :  { %s34_s6 = smov [#allocation2]   ;;  %s35_s7 = smov [#allocation3]   ;;  %s53_s0 = inlined_call_operand.hbm [shape: f32[16,32], index: 0, kind: input, shape index: {}]   ;;  %s54_s1 = inlined_call_operand.hbm [shape: f32[8,32], index: 1, kind: output, shape index: {}]  }
   0x1   :  { %s36_s8 = smov 0  }
   0x2   :  { %18 = dma.general %s53_s0, 128, %s54_s1, %s34_s6, %s35_s7, [#allocation4], %s36_s8, 0  }
   0x3   :  { %32 = dma.done.wait [#allocation2], 128 }
   0x4   :  { %33 = vsyncadd [#allocation2], 4294967168 }
   0x5   :  { %22 = vsyncmov [#allocation2] }
   0x8   :  { %s23_s13 = vpop.sfrf %22 }
   0x9   :  { %p28_p0 = scmp.ne.s32.totalorder %s23_s13, 0 }
   0xb   :  { %27 = shalt.err (%p28_p0)  }

</bundles_post_ra>
